<compile_context>
chip_gen: v5e
topology: v5e:2x2
jax: 0.10.0
libtpu: 0.0.40
codegen_flags: <defaults>
</compile_context>

<pallas_src>
import math

import jax
import jax.numpy as jnp
from jax.experimental import pallas as pl
from jax.experimental.pallas import tpu as pltpu


def _cdiv(a, b):
    return -(-a // b)


def _sublane_granule(*dtypes):
    g = 8
    for dt in dtypes:
        isz = jnp.dtype(dt).itemsize
        g = max(g, {4: 8, 2: 16, 1: 32}.get(isz, 8))
    return g


def _vmem_budget():
    """(target_block_bytes, vmem_limit_bytes) per TPU generation."""
    try:
        vmem_cap = getattr(pltpu.get_tpu_info(), "vmem_capacity_bytes", None)
    except Exception:
        vmem_cap = None
    if vmem_cap is not None and vmem_cap >= 96 * 1024 * 1024:
        # v5e / v6e: 128 MiB physical VMEM -> big blocks, generous scoped limit.
        return 8 * 1024 * 1024, 96 * 1024 * 1024
    # v7x (64 MiB physical) or unknown: conservative numbers, safe everywhere.
    return 4 * 1024 * 1024, 48 * 1024 * 1024


def _make_dice_kernel(C, TK, npb, L, needs_mask):
    def kernel(out_ref, tgt_ref, inter_ref, denom_ref):
        # out_ref / tgt_ref: (C, TK, 128) logits / targets for one spatial block.
        # inter_ref / denom_ref: (C, 8, 128) partial sums, resident across the
        # innermost (arbitrary) spatial-block axis.
        @pl.when(pl.program_id(2) == 0)
        def _():
            inter_ref[...] = jnp.zeros_like(inter_ref)
            denom_ref[...] = jnp.zeros_like(denom_ref)

        x = out_ref[...].astype(jnp.float32)  # (C, TK, 128)
        t = tgt_ref[...].astype(jnp.float32)

        if needs_mask:
            # Unclamped global spatial block id -> flat spatial index per element.
            sb = pl.program_id(0) * npb + pl.program_id(2)
            k_idx = jax.lax.broadcasted_iota(jnp.int32, (TK, 128), 0)
            l_idx = jax.lax.broadcasted_iota(jnp.int32, (TK, 128), 1)
            flat = sb * (TK * 128) + k_idx * 128 + l_idx
            mask = (flat < L)[None, :, :]  # (1, TK, 128)
            x = jnp.where(mask, x, 0.0)
            t = jnp.where(mask, t, 0.0)
        else:
            mask = None

        # Numerically stable softmax over channels (axis 0 = planes -> VPU/EUP only).
        m = jnp.max(x, axis=0, keepdims=True)            # (1, TK, 128)
        e = jnp.exp(x - m)
        inv = pl.reciprocal(jnp.sum(e, axis=0, keepdims=True))
        p = e * inv

        pt = p * t            # masked positions already 0 (t == 0 there)
        pd = p + t
        if mask is not None:
            pd = jnp.where(mask, pd, 0.0)   # p == 1/C on masked positions

        # Deferred sublane collapse: only add whole (8,128) vregs (pure VPU);
        # the final 8x128 collapse happens in the JAX glue.
        inter_ref[...] += jnp.sum(pt.reshape(C, TK // 8, 8, 128), axis=1)
        denom_ref[...] += jnp.sum(pd.reshape(C, TK // 8, 8, 128), axis=1)

    return kernel


def dice_loss(output, target, *, target_block_bytes=None, vmem_limit_bytes=None):
    """output, target: (N, C, *spatial) arrays of the same shape. Returns scalar loss."""
    assert output.shape == target.shape, "'input' and 'target' must have the same shape"
    N, C = output.shape[0], output.shape[1]
    L = math.prod(output.shape[2:])

    if target_block_bytes is None or vmem_limit_bytes is None:
        tb, vl = _vmem_budget()
        target_block_bytes = target_block_bytes or tb
        vmem_limit_bytes = vmem_limit_bytes or vl

    granule = _sublane_granule(output.dtype, target.dtype)
    itemsize = max(jnp.dtype(output.dtype).itemsize, jnp.dtype(target.dtype).itemsize)

    # Spatial axis on lanes. Pad (cheap for the tiny shapes that need it) only so
    # the (N, C, LB, 128) reshape exists and LB >= granule; everything else is
    # handled by the cdiv grid + in-kernel tail mask.
    LB = max(_cdiv(L, 128), granule)
    L_pad = LB * 128
    out3 = output.reshape(N, C, L)
    tgt3 = target.reshape(N, C, L)
    if L_pad != L:
        # TODO(synk): avoid this extra HBM copy by lane-masking an (N, C, L) input in-kernel.
        pad = ((0, 0), (0, 0), (0, L_pad - L))
        out3 = jnp.pad(out3, pad)
        tgt3 = jnp.pad(tgt3, pad)
    out4 = out3.reshape(N, C, LB, 128)
    tgt4 = tgt3.reshape(N, C, LB, 128)

    # Block size: multiple of the sublane granule, sized from the HBM-traffic target.
    tk_target = max(granule, target_block_bytes // (C * 128 * itemsize))
    TK = max(granule, min((tk_target // granule) * granule, (LB // granule) * granule))
    nsb = _cdiv(LB, TK)                 # real spatial blocks per batch element
    S = 2 if nsb >= 2 else 1            # split the reduction across v7x's two TCs
    npb = _cdiv(nsb, S)                 # spatial blocks per split
    needs_mask = (S * npb * TK * 128) != L

    kernel = _make_dice_kernel(C, TK, npb, L, needs_mask)

    def in_map(s, n, i):
        # Clamp fully out-of-range slots (they are zeroed by the in-kernel mask).
        sb = jnp.minimum(s * npb + i, nsb - 1)
        return (n, 0, sb, 0)

    def out_map(s, n, i):
        return (s, n, 0, 0, 0)

    cost = pl.CostEstimate(
        flops=10 * N * C * L_pad,
        transcendentals=N * C * L_pad,
        bytes_accessed=int(out4.size) * int(jnp.dtype(out4.dtype).itemsize)
        + int(tgt4.size) * int(jnp.dtype(tgt4.dtype).itemsize)
        + 2 * S * N * C * 8 * 128 * 4,
    )

    inter_p, denom_p = pl.pallas_call(
        kernel,
        out_shape=(
            jax.ShapeDtypeStruct((S, N, C, 8, 128), jnp.float32),
            jax.ShapeDtypeStruct((S, N, C, 8, 128), jnp.float32),
        ),
        grid_spec=pltpu.PrefetchScalarGridSpec(
            num_scalar_prefetch=0,
            grid=(S, N, npb),
            in_specs=[
                pl.BlockSpec((None, C, TK, 128), in_map),
                pl.BlockSpec((None, C, TK, 128), in_map),
            ],
            out_specs=[
                pl.BlockSpec((None, None, C, 8, 128), out_map),
                pl.BlockSpec((None, None, C, 8, 128), out_map),
            ],
        ),
        compiler_params=pltpu.CompilerParams(
            dimension_semantics=("parallel", "parallel", "arbitrary"),
            vmem_limit_bytes=vmem_limit_bytes,
        ),
        cost_estimate=cost,
    )(out4, tgt4)

    # Tiny final reduction stays in plain JAX glue.
    inter = jnp.sum(inter_p, axis=(0, 1, 3, 4))   # (C,)
    denom = jnp.sum(denom_p, axis=(0, 1, 3, 4))   # (C,)
    dice = inter / denom
    # NOTE: the reference forward defines eps=1e-5 but never uses it -> omitted here too.
    return 1.0 - jnp.mean(dice)


def _dice_loss_ref(output, target):
    """Pure-JAX reference mirroring the PyTorch forward."""
    C = output.shape[1]
    p = jax.nn.softmax(output, axis=1)
    perm = (1, 0) + tuple(range(2, output.ndim))
    p_f = jnp.transpose(p, perm).reshape(C, -1)
    t_f = jnp.transpose(target, perm).reshape(C, -1)
    inter = jnp.sum(p_f * t_f, axis=-1)
    denom = jnp.sum(p_f + t_f, axis=-1)
    return 1.0 - jnp.mean(inter / denom)


if __name__ == "__main__":
    key = jax.random.PRNGKey(0)

    # (shape, extra kwargs) — cover: tiny lane-padded case, awkward H*W with the
    # 2-way TC split, a clean unmasked multi-sublane-group case, and a forced
    # small tile that exercises cdiv tail + fully-masked clamped slots.
    cases = [
        ((2, 4, 16, 16), {}),
        ((1, 3, 40, 40), {}),
        ((2, 4, 64, 64), {}),
        ((1, 4, 48, 48), {"target_block_bytes": 16 * 1024}),
    ]

    for shape, kwargs in cases:
        key, k1, k2 = jax.random.split(key, 3)
        output = jax.random.normal(k1, shape, dtype=jnp.float32)
        target = jax.nn.softmax(jax.random.normal(k2, shape, dtype=jnp.float32), axis=1)

        loss = jax.block_until_ready(dice_loss(output, target, **kwargs))
        ref = jax.block_until_ready(_dice_loss_ref(output, target))
        assert jnp.allclose(loss, ref, rtol=1e-5, atol=1e-6), (shape, loss, ref)

    print("KERNEL_OK")
</pallas_src>

<mosaic_0001>
module attributes {stable_mosaic.version = 11 : i64} {
  func.func @kernel(%arg0: i32, %arg1: i32, %arg2: i32, %arg3: memref<1x4x8x128xf32, #tpu.memory_space<vmem>>, %arg4: memref<1x4x8x128xf32, #tpu.memory_space<vmem>>, %arg5: memref<1x1x4x8x128xf32, #tpu.memory_space<vmem>>, %arg6: memref<1x1x4x8x128xf32, #tpu.memory_space<vmem>>) attributes {dimension_semantics = [#tpu.dimension_semantics<parallel>, #tpu.dimension_semantics<parallel>, #tpu.dimension_semantics<arbitrary>], iteration_bounds = array<i64: 1, 2, 1>, scalar_prefetch = 0 : i64, scratch_operands = 0 : i64, tpu.core_type = #tpu.core_type<tc>, window_params = [{transform_indices = @transform_0, window_bounds = array<i64: 1, 4, 8, 128>}, {transform_indices = @transform_1, window_bounds = array<i64: 1, 4, 8, 128>}, {transform_indices = @transform_2, window_bounds = array<i64: 1, 1, 4, 8, 128>}, {transform_indices = @transform_3, window_bounds = array<i64: 1, 1, 4, 8, 128>}]} {
    %c0_i32 = arith.constant 0 : i32
    %0 = arith.cmpi eq, %arg2, %c0_i32 : i32
    %1 = arith.extui %0 : i1 to i32
    %c0_i32_0 = arith.constant 0 : i32
    %2 = arith.cmpi ne, %1, %c0_i32_0 : i32
    scf.if %2 {
      %cst_34 = arith.constant 0.000000e+00 : f32
      %60 = vector.broadcast %cst_34 : f32 to vector<4x8x128xf32>
      %c0_35 = arith.constant 0 : index
      %c0_36 = arith.constant 0 : index
      %c0_37 = arith.constant 0 : index
      %c0_38 = arith.constant 0 : index
      %c0_39 = arith.constant 0 : index
      %61 = vector.load %arg5[%c0_35, %c0_36, %c0_37, %c0_38, %c0_39] : memref<1x1x4x8x128xf32, #tpu.memory_space<vmem>>, vector<1x1x4x8x128xf32>
      %62 = vector.shape_cast %61 : vector<1x1x4x8x128xf32> to vector<4x8x128xf32>
      %63 = vector.shape_cast %60 : vector<4x8x128xf32> to vector<1x1x4x8x128xf32>
      tpu.vector_store %arg5[%c0_35, %c0_36, %c0_37, %c0_38, %c0_39], %63 {strides = array<i32>} : memref<1x1x4x8x128xf32, #tpu.memory_space<vmem>>, vector<1x1x4x8x128xf32>,
      %cst_40 = arith.constant 0.000000e+00 : f32
      %64 = vector.broadcast %cst_40 : f32 to vector<4x8x128xf32>
      %c0_41 = arith.constant 0 : index
      %c0_42 = arith.constant 0 : index
      %c0_43 = arith.constant 0 : index
      %c0_44 = arith.constant 0 : index
      %c0_45 = arith.constant 0 : index
      %65 = vector.load %arg6[%c0_41, %c0_42, %c0_43, %c0_44, %c0_45] : memref<1x1x4x8x128xf32, #tpu.memory_space<vmem>>, vector<1x1x4x8x128xf32>
      %66 = vector.shape_cast %65 : vector<1x1x4x8x128xf32> to vector<4x8x128xf32>
      %67 = vector.shape_cast %64 : vector<4x8x128xf32> to vector<1x1x4x8x128xf32>
      tpu.vector_store %arg6[%c0_41, %c0_42, %c0_43, %c0_44, %c0_45], %67 {strides = array<i32>} : memref<1x1x4x8x128xf32, #tpu.memory_space<vmem>>, vector<1x1x4x8x128xf32>,
    } else {
    }
    %c0 = arith.constant 0 : index
    %c0_1 = arith.constant 0 : index
    %c0_2 = arith.constant 0 : index
    %c0_3 = arith.constant 0 : index
    %3 = vector.load %arg3[%c0, %c0_1, %c0_2, %c0_3] : memref<1x4x8x128xf32, #tpu.memory_space<vmem>>, vector<1x4x8x128xf32>
    %4 = vector.shape_cast %3 : vector<1x4x8x128xf32> to vector<4x8x128xf32>
    %c0_4 = arith.constant 0 : index
    %c0_5 = arith.constant 0 : index
    %c0_6 = arith.constant 0 : index
    %c0_7 = arith.constant 0 : index
    %5 = vector.load %arg4[%c0_4, %c0_5, %c0_6, %c0_7] : memref<1x4x8x128xf32, #tpu.memory_space<vmem>>, vector<1x4x8x128xf32>
    %6 = vector.shape_cast %5 : vector<1x4x8x128xf32> to vector<4x8x128xf32>
    %c1_i32 = arith.constant 1 : i32
    %7 = arith.muli %arg0, %c1_i32 : i32
    %8 = arith.addi %7, %arg2 : i32
    %9 = tpu.iota {dimensions = array<i32: 0>} : vector<8x128xi32>
    %10 = tpu.iota {dimensions = array<i32: 1>} : vector<8x128xi32>
    %c1024_i32 = arith.constant 1024 : i32
    %11 = arith.muli %8, %c1024_i32 : i32
    %c128_i32 = arith.constant 128 : i32
    %12 = vector.broadcast %c128_i32 : i32 to vector<8x128xi32>
    %13 = arith.muli %9, %12 : vector<8x128xi32>
    %14 = vector.broadcast %11 : i32 to vector<8x128xi32>
    %15 = arith.addi %14, %13 : vector<8x128xi32>
    %16 = arith.addi %15, %10 : vector<8x128xi32>
    %c256_i32 = arith.constant 256 : i32
    %17 = vector.broadcast %c256_i32 : i32 to vector<8x128xi32>
    %18 = arith.cmpi slt, %16, %17 : vector<8x128xi32>
    %19 = vector.shape_cast %18 : vector<8x128xi1> to vector<1x8x128xi1>
    %cst = arith.constant 0.000000e+00 : f32
    %20 = vector.shape_cast %19 : vector<1x8x128xi1> to vector<1x8x128xi1>
    %21 = vector.broadcast %20 : vector<1x8x128xi1> to vector<4x8x128xi1>
    %22 = vector.broadcast %cst : f32 to vector<4x8x128xf32>
    %23 = arith.select %21, %4, %22 : vector<4x8x128xi1>, vector<4x8x128xf32>
    %cst_8 = arith.constant 0.000000e+00 : f32
    %24 = vector.shape_cast %19 : vector<1x8x128xi1> to vector<1x8x128xi1>
    %25 = vector.broadcast %24 : vector<1x8x128xi1> to vector<4x8x128xi1>
    %26 = vector.broadcast %cst_8 : f32 to vector<4x8x128xf32>
    %27 = arith.select %25, %6, %26 : vector<4x8x128xi1>, vector<4x8x128xf32>
    %cst_9 = arith.constant dense<0xFF800000> : vector<8x128xf32>
    %28 = vector.multi_reduction <maximumf>, %23, %cst_9 [0] : vector<4x8x128xf32> to vector<8x128xf32>
    %29 = vector.shape_cast %28 : vector<8x128xf32> to vector<1x8x128xf32>
    %30 = vector.broadcast %29 : vector<1x8x128xf32> to vector<4x8x128xf32>
    %31 = arith.subf %23, %30 : vector<4x8x128xf32>
    %32 = math.exp %31 : vector<4x8x128xf32>
    %cst_10 = arith.constant dense<0.000000e+00> : vector<8x128xf32>
    %33 = vector.multi_reduction <add>, %32, %cst_10 [0] : vector<4x8x128xf32> to vector<8x128xf32>
    %34 = vector.shape_cast %33 : vector<8x128xf32> to vector<1x8x128xf32>
    %35 = tpu.reciprocal %34 : vector<1x8x128xf32> -> vector<1x8x128xf32>
    %36 = vector.broadcast %35 : vector<1x8x128xf32> to vector<4x8x128xf32>
    %37 = arith.mulf %32, %36 : vector<4x8x128xf32>
    %38 = arith.mulf %37, %27 : vector<4x8x128xf32>
    %39 = arith.addf %37, %27 : vector<4x8x128xf32>
    %cst_11 = arith.constant 0.000000e+00 : f32
    %40 = vector.shape_cast %19 : vector<1x8x128xi1> to vector<1x8x128xi1>
    %41 = vector.broadcast %40 : vector<1x8x128xi1> to vector<4x8x128xi1>
    %42 = vector.broadcast %cst_11 : f32 to vector<4x8x128xf32>
    %43 = arith.select %41, %39, %42 : vector<4x8x128xi1>, vector<4x8x128xf32>
    %c0_12 = arith.constant 0 : index
    %c0_13 = arith.constant 0 : index
    %c0_14 = arith.constant 0 : index
    %c0_15 = arith.constant 0 : index
    %c0_16 = arith.constant 0 : index
    %44 = vector.load %arg5[%c0_12, %c0_13, %c0_14, %c0_15, %c0_16] : memref<1x1x4x8x128xf32, #tpu.memory_space<vmem>>, vector<1x1x4x8x128xf32>
    %45 = vector.shape_cast %44 : vector<1x1x4x8x128xf32> to vector<4x8x128xf32>
    %46 = vector.shape_cast %38 : vector<4x8x128xf32> to vector<4x1x8x128xf32>
    %cst_17 = arith.constant dense<0.000000e+00> : vector<4x8x128xf32>
    %47 = vector.multi_reduction <add>, %46, %cst_17 [1] : vector<4x1x8x128xf32> to vector<4x8x128xf32>
    %48 = arith.addf %45, %47 : vector<4x8x128xf32>
    %c0_18 = arith.constant 0 : index
    %c0_19 = arith.constant 0 : index
    %c0_20 = arith.constant 0 : index
    %c0_21 = arith.constant 0 : index
    %c0_22 = arith.constant 0 : index
    %49 = vector.load %arg5[%c0_18, %c0_19, %c0_20, %c0_21, %c0_22] : memref<1x1x4x8x128xf32, #tpu.memory_space<vmem>>, vector<1x1x4x8x128xf32>
    %50 = vector.shape_cast %49 : vector<1x1x4x8x128xf32> to vector<4x8x128xf32>
    %51 = vector.shape_cast %48 : vector<4x8x128xf32> to vector<1x1x4x8x128xf32>
    tpu.vector_store %arg5[%c0_18, %c0_19, %c0_20, %c0_21, %c0_22], %51 {strides = array<i32>} : memref<1x1x4x8x128xf32, #tpu.memory_space<vmem>>, vector<1x1x4x8x128xf32>,
    %c0_23 = arith.constant 0 : index
    %c0_24 = arith.constant 0 : index
    %c0_25 = arith.constant 0 : index
    %c0_26 = arith.constant 0 : index
    %c0_27 = arith.constant 0 : index
    %52 = vector.load %arg6[%c0_23, %c0_24, %c0_25, %c0_26, %c0_27] : memref<1x1x4x8x128xf32, #tpu.memory_space<vmem>>, vector<1x1x4x8x128xf32>
    %53 = vector.shape_cast %52 : vector<1x1x4x8x128xf32> to vector<4x8x128xf32>
    %54 = vector.shape_cast %43 : vector<4x8x128xf32> to vector<4x1x8x128xf32>
    %cst_28 = arith.constant dense<0.000000e+00> : vector<4x8x128xf32>
    %55 = vector.multi_reduction <add>, %54, %cst_28 [1] : vector<4x1x8x128xf32> to vector<4x8x128xf32>
    %56 = arith.addf %53, %55 : vector<4x8x128xf32>
    %c0_29 = arith.constant 0 : index
    %c0_30 = arith.constant 0 : index
    %c0_31 = arith.constant 0 : index
    %c0_32 = arith.constant 0 : index
    %c0_33 = arith.constant 0 : index
    %57 = vector.load %arg6[%c0_29, %c0_30, %c0_31, %c0_32, %c0_33] : memref<1x1x4x8x128xf32, #tpu.memory_space<vmem>>, vector<1x1x4x8x128xf32>
    %58 = vector.shape_cast %57 : vector<1x1x4x8x128xf32> to vector<4x8x128xf32>
    %59 = vector.shape_cast %56 : vector<4x8x128xf32> to vector<1x1x4x8x128xf32>
    tpu.vector_store %arg6[%c0_29, %c0_30, %c0_31, %c0_32, %c0_33], %59 {strides = array<i32>} : memref<1x1x4x8x128xf32, #tpu.memory_space<vmem>>, vector<1x1x4x8x128xf32>,
    return
  }
  func.func @transform_0(%arg0: i32, %arg1: i32, %arg2: i32) -> (i32, i32, i32, i32) {
    %c1_i32 = arith.constant 1 : i32
    %0 = arith.muli %arg0, %c1_i32 : i32
    %1 = arith.addi %0, %arg2 : i32
    %c0_i32 = arith.constant 0 : i32
    %2 = arith.minsi %1, %c0_i32 : i32
    %c0_i32_0 = arith.constant 0 : i32
    %c0_i32_1 = arith.constant 0 : i32
    %c0_i32_2 = arith.constant 0 : i32
    return %arg1, %c0_i32_0, %2, %c0_i32_1 : i32, i32, i32, i32
  }
  func.func @transform_1(%arg0: i32, %arg1: i32, %arg2: i32) -> (i32, i32, i32, i32) {
    %c1_i32 = arith.constant 1 : i32
    %0 = arith.muli %arg0, %c1_i32 : i32
    %1 = arith.addi %0, %arg2 : i32
    %c0_i32 = arith.constant 0 : i32
    %2 = arith.minsi %1, %c0_i32 : i32
    %c0_i32_0 = arith.constant 0 : i32
    %c0_i32_1 = arith.constant 0 : i32
    %c0_i32_2 = arith.constant 0 : i32
    return %arg1, %c0_i32_0, %2, %c0_i32_1 : i32, i32, i32, i32
  }
  func.func @transform_2(%arg0: i32, %arg1: i32, %arg2: i32) -> (i32, i32, i32, i32, i32) {
    %c0_i32 = arith.constant 0 : i32
    %c0_i32_0 = arith.constant 0 : i32
    %c0_i32_1 = arith.constant 0 : i32
    %c0_i32_2 = arith.constant 0 : i32
    return %arg0, %arg1, %c0_i32, %c0_i32_0, %c0_i32_1 : i32, i32, i32, i32, i32
  }
  func.func @transform_3(%arg0: i32, %arg1: i32, %arg2: i32) -> (i32, i32, i32, i32, i32) {
    %c0_i32 = arith.constant 0 : i32
    %c0_i32_0 = arith.constant 0 : i32
    %c0_i32_1 = arith.constant 0 : i32
    %c0_i32_2 = arith.constant 0 : i32
    return %arg0, %arg1, %c0_i32, %c0_i32_0, %c0_i32_1 : i32, i32, i32, i32, i32
  }
}

</mosaic_0001>

<bundles_post_ra>
// kernel: tpu_custom_call.1
= control target key start
LH: loop header
LB: loop body
LE: loop exit
PB: predicated region body
PF: predicated region fallthrough
CT: control target
= control target key end

     0   :  { %s1132_s0 = inlined_call_operand.hbm [shape: f32[2,4,8,128], index: 0, kind: input, shape index: {}]   ;;  %s1133_s1 = inlined_call_operand.hbm [shape: f32[2,4,8,128], index: 1, kind: input, shape index: {}]   ;;  %s1134_s2 = inlined_call_operand.hbm [shape: f32[1,2,4,8,128], index: 2, kind: output, shape index: {0}]   ;;  %s1135_s3 = inlined_call_operand.hbm [shape: f32[1,2,4,8,128], index: 3, kind: output, shape index: {1}]  }
   0x1   :  { %1136 = sst [smem:[#allocation14_spill]] %s1132_s0 }
   0x2   :  { %9 = vsyncpa [#allocation3], 0 }
   0x3   :  { %11 = vsyncpa [#allocation3 + $0x1], 0 }
   0x4   :  { %12 = vsyncpa [#allocation6], 0 }
   0x5   :  { %14 = vsyncpa [#allocation6 + $0x1], 0 }
   0x6   :  { %15 = vsyncpa [#allocation4], 0 }
   0x7   :  { %17 = vsyncpa [#allocation4 + $0x1], 0 }
   0x8   :  { %18 = vsyncpa [#allocation9], 0 }
   0x9   :  { %20 = vsyncpa [#allocation9 + $0x1], 0  ;;  %s928_s12 = smov 0   ;;  %s930_s13 = smov 0  }
   0xa   :  { %s932_s14 = smov 0   ;;  %s934_s15 = smov 0  }
   0xb   :  { %s936_s16 = smov 0   ;;  %s938_s17 = smov 0  }
   0xc LB: > { %s610_s18 = sadd.s32 4294967295, %s902_s17   ;;  %s611_s19 = sadd.s32 4294967294, %s902_s17   ;;  %s902_s17 = sphi %s938_s17, %s26_s17   ;;  %s898_s16 = sphi %s936_s16, %s1147_s16   ;;  %s894_s15 = sphi %s934_s15, %s1146_s15   ;;  %s890_s14 = sphi %s932_s14, %s1145_s14   ;;  %s886_s13 = sphi %s930_s13, %s1144_s13   ;;  %s882_s12 = sphi %s928_s12, %s1143_s12  }
   0xd   : > { %s41_s20 = sadd.s32 1, %s898_s16  ;;  %s60_s21 = sadd.s32 1, %s890_s14 }
   0xe   : > { %p43_p0 = scmp.ge.s32.totalorder %s41_s20, 2  ;;  %p67_p1 = scmp.ne.s32.totalorder %s890_s14, %s886_s13 }
   0xf   : > { %p68_p2 = scmp.eq.s32.totalorder %s902_s17, 0  ;;  %p73_p3 = scmp.ne.s32.totalorder %s886_s13, %s882_s12 }
  0x10   : > { %s1149_s20 = smov (%p43_p0, %s41_s20), 0  ;;  %p74_p5 = scmp.eq.s32.totalorder %s610_s18, 0 }
  0x11   : > { %p969_p4 = por %p68_p2, %p67_p1  ;;  %s55_s23 = ssub.s32 %s898_s16, %s1149_s20 }
  0x12   : > { %p133_p6 = scmp.eq.s32.totalorder %s610_s18, 1  ;;  %p58_p7 = scmp.eq.s32.totalorder %s55_s23, 0 }
  0x13   : > { %p975_p8 = por %p74_p5, %p73_p3  ;;  %p139_p10 = scmp.eq.s32.totalorder %s611_s19, 1 }
  0x14   : > { %p979_p9 = por %p133_p6, %p67_p1  ;;  %p613_p12 = scmp.ge.s32.totalorder %s902_s17, 2 }
  0x15   : > { %s984_s26 = scalar_select %p58_p7, %s890_s14, %s60_s21  }
  0x16   : > { %p986_p11 = por %p139_p10, %p73_p3  ;;  %p659_p13 = scmp.lt.s32.totalorder %s902_s17, 2 }
  0x17   : > { %s993_s28 = sand.u32 1, %s890_s14   ;;  %s633_s30 = sshll.u32 %s898_s16, 5 }
  0x18   : > { %s614_s29 = sshll.u32 %s993_s28, 5  ;;  %s1141_s0 = sld [smem:[#allocation14_spill]] }
  0x19   : > { %s191_s7 = scalar_lea.vmem [#allocation2], %s614_s29  ;;  %p1002_p0 = pnand %p659_p13, %p969_p4 }
  0x1a   : > { %s203_s8 = sshll.u32 %s191_s7, 4  ;;  %p620_p1 = scmp.ge.s32.totalorder %s902_s17, 1  ;;  %s204_s8 = int_to_ptr.vmem [resolvable:$true] %s203_s8 }
  0x1b   : > { %s188_s11 = scalar_lea.sflag [#allocation3], %s993_s28  ;;  %s904_s18 = smov 128  }
  0x1c   : > { %s905_s19 = smov 8   ;;  %p237_p2 = scmp.lt.s32.totalorder %s902_s17, 3 }
  0x1d   : > { %s226_s4 = scalar_lea.hbm %s1133_s1, %s633_s30  ;;  %s217_s22 = scalar_lea.vmem [#allocation5], %s614_s29 }
  0x1e   : > { %s200_s6 = scalar_lea.hbm %s1141_s0, %s633_s30  ;;  %p238_p3 = pnand %p620_p1, %p237_p2 }
  0x1f   : > { %s201_s9 = sshll.u32 %s200_s6, 4  ;;  %s227_s5 = sshll.u32 %s226_s4, 4  ;;  %s202_s9 = int_to_ptr.hbm [resolvable:$true] %s201_s9  ;;  %s228_s5 = int_to_ptr.hbm [resolvable:$true] %s227_s5 }
  0x20   : > { %648 = dma.hbm_to_vmem [thread:$0]  (!%p1002_p0), %s202_s9, 512, %s204_s8, %s188_s11, %s904_s18, %s904_s18, %s905_s19  }
  0x21   : > { %s229_s6 = sshll.u32 %s217_s22, 4  ;;  %s214_s7 = scalar_lea.sflag [#allocation6], %s993_s28  ;;  %s230_s6 = int_to_ptr.vmem [resolvable:$true] %s229_s6 }
  0x22   : > { %651 = dma.hbm_to_vmem [thread:$0]  (!%p1002_p0), %s228_s5, 512, %s230_s6, %s214_s7, %s904_s18, %s904_s18, %s905_s19  }
  0x23   : > { %241 = sbr.rel (%p238_p3) target bundleno = 119 (0x77), region = 28  ;;  %s1018_s0 = sand.u32 (!%p238_p3), 1, %s886_s13  }
  0x24   : > { %s1021_s8 = sshll.u32 (!%p238_p3), %s1018_s0, 5  ;;  %s244_s30 = scalar_lea.sflag (!%p238_p3), [#allocation3], %s1018_s0 }
  0x25   : > { %s247_s9 = scalar_lea.vmem (!%p238_p3), [#allocation2], %s1021_s8 }
  0x28   : > { %865 = dma.done.wait (%p975_p8), %s244_s30, 512  }
  0x29   : > { %867 = vsyncadd (%p975_p8), %s244_s30, 4294966784  ;;  %s254_s28 = scalar_lea.sflag [#allocation6], %s1018_s0  ;;  %s1031_s29 = scalar_lea.vmem [#allocation5], %s1021_s8 }
  0x2a   : > { %869 = dma.done.wait (%p975_p8), %s254_s28, 512  }
  0x2b   : > { %871 = vsyncadd (%p975_p8), %s254_s28, 4294966784  ;;  %v318_v0 = vlaneseq  ;;  %v309_v5 = vld [vmem:[%s247_s9] sm:$0xff]  ;;  %v310_v6 = vld [vmem:[%s247_s9 + $0x8] sm:$0xff]  ;;  %s635_s24 = sshll.u32 %s894_s15, 5  ;;  %s283_s15 = scalar_lea.vmem [#allocation7], %s1021_s8 }
  0x2c   : > { %v311_v7 = vld [vmem:[%s247_s9 + $0x10] sm:$0xff]  ;;  %v312_v8 = vld [vmem:[%s247_s9 + $0x18] sm:$0xff]  ;;  %v313_v37 = vld [vmem:[%s1031_s29] sm:$0xff]  ;;  %s437_s18 = scalar_lea.hbm %s1134_s2, %s635_s24  ;;  %s438_s19 = sshll.u32 %s283_s15, 4  ;;  %s1076_s19 = int_to_ptr.vmem [resolvable:$true] %s438_s19 }
  0x2d   : > { %v319_v1 = vshrl.u32 %v318_v0, 7  ;;  %v321_v2 = vand.u32 127, %v318_v0  ;;  %v314_v40 = vld [vmem:[%s1031_s29 + $0x8] sm:$0xff]  ;;  %v315_v41 = vld [vmem:[%s1031_s29 + $0x10] sm:$0xff]  ;;  %v316_v42 = vld [vmem:[%s1031_s29 + $0x18] sm:$0xff]  ;;  %s456_s4 = scalar_lea.hbm %s1135_s3, %s635_s24  ;;  %s440_s5 = sshll.u32 %s437_s18, 4  ;;  %s441_s5 = int_to_ptr.hbm [resolvable:$true] %s440_s5 }
  0x2e   : > { %s290_s22 = scalar_lea.vmem [#allocation8], %s1021_s8  ;;  %s459_s7 = sshll.u32 %s456_s4, 4  ;;  %s1081_s7 = int_to_ptr.hbm [resolvable:$true] %s459_s7 }
  0x2f   : > { %v323_v3 = vmul.u32 128, %v319_v1  ;;  %s457_s6 = sshll.u32 %s290_s22, 4  ;;  %s419_s30 = scalar_lea.sflag [#allocation4], %s1018_s0  ;;  %s1079_s6 = int_to_ptr.vmem [resolvable:$true] %s457_s6 }
  0x30   : > { %s798_s9 = sshra.s32 %s441_s5, 4  ;;  %s804_s24 = scalar_lea.hbm %s1134_s2, 64  ;;  %s799_s9 = int_to_ptr.hbm [resolvable:$true] %s798_s9 }
  0x31   : > { %v1037_v4 = vadd.s32 %v323_v3, %v321_v2  ;;  %s800_s28 = scalar_lea.hbm %s799_s9, 32  ;;  %p805_p7 = scmp.lt.s32.totalorder %s799_s9, %s1134_s2 }
  0x32   : > { %p801_p4 = scmp.ne.s32.totalorder %s799_s9, %s800_s28  ;;  %p806_p8 = scmp.lt.s32.totalorder %s804_s24, %s800_s28 }
  0x33   : > { %vm327_vm0 = vcmp.lt.s32.totalorder %v1037_v4, 256 }
  0x34   : > { %v330_v9 = vsel %vm327_vm0, %v309_v5, 0.0  ;;  %v331_v10 = vsel %vm327_vm0, %v310_v6, 0.0  ;;  %v332_v11 = vsel %vm327_vm0, %v311_v7, 0.0  ;;  %v333_v12 = vsel %vm327_vm0, %v312_v8, 0.0  ;;  %p802_p5 = pnand %p801_p4, %p979_p9  ;;  %p807_p10 = por %p806_p8, %p805_p7 }
  0x35   : > { %v338_v13 = vmax.f32 %v330_v9, %v331_v10  ;;  %v339_v14 = vmax.f32 %v332_v11, %v333_v12  ;;  %v334_v43 = vsel %vm327_vm0, %v313_v37, 0.0  ;;  %v335_v46 = vsel %vm327_vm0, %v314_v40, 0.0 }
  0x36   : > { %v336_v47 = vsel %vm327_vm0, %v315_v41, 0.0  ;;  %v337_v48 = vsel %vm327_vm0, %v316_v42, 0.0  ;;  %p803_p6 = pneg %p802_p5 }
  0x37   : > { %v340_v15 = vmax.f32 %v338_v13, %v339_v14 }
  0x38   : > { %p808_p13 = pnand %p807_p10, %p803_p6 }
  0x39   : > { %v341_v16 = vsub.f32 %v330_v9, %v340_v15  ;;  %v342_v17 = vsub.f32 %v331_v10, %v340_v15  ;;  %v343_v18 = vsub.f32 %v332_v11, %v340_v15  ;;  %v344_v19 = vsub.f32 %v333_v12, %v340_v15 }
  0x3b   : > { %v345_v20 = vmul.f32 1.442695, %v341_v16  ;;  %v347_v21 = vmul.f32 1.442695, %v342_v17  ;;  %v349_v22 = vmul.f32 1.442695, %v343_v18 }
  0x3c   : > { %v351_v23 = vmul.f32 1.442695, %v344_v19 }
  0x3d   : > { %714 = vpow2.f32 %v345_v20 }
  0x3e   : > { %716 = vpow2.f32 %v347_v21 }
  0x3f   : > { %718 = vpow2.f32 %v349_v22 }
  0x40   : > { %720 = vpow2.f32 %v351_v23 }
  0x43   : > { %v715_v24 = vpop.eup %714 }
  0x44   : > { %v717_v25 = vpop.eup %716 }
  0x45   : > { %v719_v26 = vpop.eup %718  ;;  %v353_v27 = vadd.f32 %v717_v25, %v715_v24 }
  0x46   : > { %v721_v28 = vpop.eup %720 }
  0x47   : > { %v354_v29 = vadd.f32 %v719_v26, %v353_v27 }
  0x49   : > { %v355_v30 = vadd.f32 %v721_v28, %v354_v29 }
  0x4b   : > { %722 = vrcp.f32 %v355_v30  ;;  %v367_v33 = vand.u32 2147483648, %v355_v30  ;;  %vm361_vm1 = vweird.f32 %v355_v30  ;;  %v365_v35 = vand.u32 2147483647, %v355_v30 }
  0x4d   : > { %v368_v38 = vor.u32 1.1754944e-38, %v367_v33  ;;  %vm366_vm4 = vcmp.eq.f32.partialorder %v365_v35, 8.507059e+37 }
  0x51   : > { %v723_v31 = vpop.eup %722 }
  0x52   : > { %v357_v32 = vmul.f32 %v723_v31, %v355_v30  ;;  %vm362_vm2 = vweird.f32 %v723_v31 }
  0x53   : > { %vm363_vm3 = vmor %vm361_vm1, %vm362_vm2 }
  0x54   : > { %v358_v34 = vsub.f32 1.0, %v357_v32 }
  0x56   : > { %v359_v36 = vmul.f32 %v723_v31, %v358_v34 }
  0x58   : > { %v360_v39 = vadd.f32 %v723_v31, %v359_v36 }
  0x5a   : > { %v364_v44 = vsel %vm363_vm3, %v723_v31, %v360_v39 }
  0x5b   : > { %v369_v45 = vsel %vm366_vm4, %v368_v38, %v364_v44 }
  0x5c   : > { %v370_v49 = vmul.f32 %v715_v24, %v369_v45  ;;  %v371_v50 = vmul.f32 %v717_v25, %v369_v45  ;;  %v372_v51 = vmul.f32 %v719_v26, %v369_v45  ;;  %v373_v52 = vmul.f32 %v721_v28, %v369_v45 }
  0x5e   : > { %v374_v53 = vmul.f32 %v370_v49, %v334_v43  ;;  %v375_v54 = vmul.f32 %v371_v50, %v335_v46  ;;  %v376_v55 = vmul.f32 %v372_v51, %v336_v47  ;;  %v377_v56 = vmul.f32 %v373_v52, %v337_v48 }
  0x5f   : > { %v378_v57 = vadd.f32 %v370_v49, %v334_v43  ;;  %v379_v58 = vadd.f32 %v371_v50, %v335_v46  ;;  %v380_v59 = vadd.f32 %v372_v51, %v336_v47  ;;  %v381_v60 = vadd.f32 %v373_v52, %v337_v48 }
  0x60   : > { %398 = vst [vmem:[%s283_s15] sm:$0xff] %v374_v53 }
  0x61   : > { %v382_v61 = vsel %vm327_vm0, %v378_v57, 0.0  ;;  %v383_v62 = vsel %vm327_vm0, %v379_v58, 0.0  ;;  %v384_v63 = vsel %vm327_vm0, %v380_v59, 0.0  ;;  %v385_v0 = vsel %vm327_vm0, %v381_v60, 0.0  ;;  %399 = vst [vmem:[%s283_s15 + $0x8] sm:$0xff] %v375_v54 }
  0x62   : > { %400 = vst [vmem:[%s283_s15 + $0x10] sm:$0xff] %v376_v55 }
  0x63   : > { %401 = vst [vmem:[%s283_s15 + $0x18] sm:$0xff] %v377_v56 }
  0x64   : > { %414 = vst [vmem:[%s290_s22] sm:$0xff] %v382_v61 }
  0x65   : > { %415 = vst [vmem:[%s290_s22 + $0x8] sm:$0xff] %v383_v62 }
  0x66   : > { %416 = vst [vmem:[%s290_s22 + $0x10] sm:$0xff] %v384_v63 }
  0x67   : > { %417 = vst [vmem:[%s290_s22 + $0x18] sm:$0xff] %v385_v0 }
  0x68   : > { %811 = shalt.err (!%p808_p13)
}
  0x69   : > { %s906_s18 = smov 128   ;;  %s907_s15 = smov 8  }
  0x6a   : > { %641 = dma.vmem_to_hbm [thread:$0]  (%p979_p9), %s1076_s19, 512, %s441_s5, %s419_s30, %s906_s18, %s906_s18, %s907_s15  }
  0x6b   : > { %s424_s21 = scalar_lea.sflag [#allocation9], %s1018_s0  ;;  %s826_s23 = sshra.s32 %s1081_s7, 4  ;;  %s827_s23 = int_to_ptr.hbm [resolvable:$true] %s826_s23 }
  0x6c   : > { %s828_s4 = scalar_lea.hbm %s827_s23, 32  ;;  %s832_s28 = scalar_lea.hbm %s1135_s3, 64 }
  0x6d   : > { %p829_p0 = scmp.ne.s32.totalorder %s827_s23, %s828_s4  ;;  %p833_p3 = scmp.lt.s32.totalorder %s827_s23, %s1135_s3 }
  0x6e   : > { %p834_p4 = scmp.lt.s32.totalorder %s832_s28, %s828_s4 }
  0x6f   : > { %p830_p1 = pnand %p829_p0, %p979_p9 }
  0x70   : > { %p835_p5 = por %p834_p4, %p833_p3 }
  0x71   : > { %p831_p2 = pneg %p830_p1 }
  0x73   : > { %p836_p6 = pnand %p835_p5, %p831_p2 }
  0x75   : > { %839 = shalt.err (!%p836_p6)
}
  0x76   : > { %642 = dma.vmem_to_hbm [thread:$0]  (%p979_p9), %s1079_s6, 512, %s1081_s7, %s424_s21, %s906_s18, %s906_s18, %s907_s15  }
  0x77 PF: > { %s474_s0 = sand.u32 1, %s882_s12   ;;  %p653_p7 = pnand %p613_p12, %p986_p11 }
  0x78   : > { %s475_s19 = scalar_lea.sflag [#allocation4], %s474_s0 }
  0x79   : > { %p654_p8 = pneg %p653_p7 }
  0x7b   : > { %873 = dma.done.wait (%p654_p8), %s475_s19, 512  }
  0x7c   : > { %875 = vsyncadd (%p654_p8), %s475_s19, 4294966784  ;;  %s485_s5 = scalar_lea.sflag [#allocation9], %s474_s0 }
  0x7d   : > { %877 = dma.done.wait (%p654_p8), %s485_s5, 512  }
  0x7e   : > { %879 = vsyncadd (%p654_p8), %s485_s5, 4294966784  ;;  %s26_s17 = sadd.s32 1, %s902_s17   ;;  %s1143_s12 = smov %s886_s13 }
  0x7f   : > { %p23_p10 = scmp.ge.s32.totalorder %s26_s17, 4   ;;  %s1144_s13 = smov %s890_s14 }
  0x80   : > { %s1145_s14 = smov %s984_s26  ;;  %s1146_s15 = smov %s898_s16 }
  0x81   : > { %s1147_s16 = smov %s1149_s20  ;;  %25 = sbr.rel (!%p23_p10) target bundleno = 12 (0xc), region = 107 }
  0x86   :  { %491 = vsyncpa [#allocation3], 1 }
  0x87   :  { %493 = vsyncpa [#allocation3 + $0x1], 1 }
  0x88   :  { %494 = vsyncpa [#allocation6], 1 }
  0x89   :  { %496 = vsyncpa [#allocation6 + $0x1], 1 }
  0x8a   :  { %497 = vsyncpa [#allocation4], 1 }
  0x8b   :  { %499 = vsyncpa [#allocation4 + $0x1], 1 }
  0x8c   :  { %500 = vsyncpa [#allocation9], 1 }
  0x8d   :  { %502 = vsyncpa [#allocation9 + $0x1], 1 }

</bundles_post_ra>
